<compile_context>
chip_gen: v6e
topology: v6e:2x2x1
jax: 0.10.0
libtpu: 0.0.40
codegen_flags: <defaults>
</compile_context>

<pallas_src>
import functools

import jax
import jax.numpy as jnp
from jax import lax
from jax.experimental import pallas as pl
from jax.experimental.pallas import tpu as pltpu


def _focal_loss_kernel(pred_ref, tgt_ref, msk_ref, loss_ref, *, gamma):
    """Fully fused focal BCE over the whole gathered slab (single grid step).

    pred_ref : (B, C, M) VMEM -- gathered logits, class on sublanes, query on lanes
    tgt_ref  : (B, 1, M) VMEM int32 -- class ids (0 = background, 1..C = classes)
    msk_ref  : (B, 1, M) VMEM f32   -- positive-sample mask
    loss_ref : (1, 1)    VMEM f32   -- scalar output: loss.sum() / mask.sum()
    """
    x = pred_ref[...].astype(jnp.float32)          # (B, C, M)
    tgt = tgt_ref[...]                             # (B, 1, M) int32
    msk = msk_ref[...]                             # (B, 1, M) f32

    # one_hot(target, C+1)[..., 1:] : class id == (class-axis index + 1).
    cls = lax.broadcasted_iota(jnp.int32, x.shape, 1)
    one_hot = (cls + 1 == tgt).astype(jnp.float32)         # broadcast over class axis

    # Exact sigmoid; e = exp(-|x|) is shared with the stable BCE log1p term
    # (single EUP exp per element).
    e = jnp.exp(-jnp.abs(x))
    r = 1.0 / (1.0 + e)
    sig = jnp.where(x >= 0.0, r, e * r)                    # == sigmoid(x), exact

    pt = jnp.abs(one_hot - sig)
    # torch BCEWithLogits (reduction='none'), numerically stable form.
    bce = jnp.maximum(x, 0.0) - x * one_hot + jnp.log1p(e)

    if float(gamma) == 2.0:
        focal = pt * pt
    else:
        focal = jnp.power(pt, jnp.float32(gamma))

    # Mask after the class-axis reduction (saves C-1 multiplies per query).
    per_query = jnp.sum(bce * focal, axis=1, keepdims=True) * msk    # (B, 1, M)

    loss_sum = jnp.sum(per_query)
    num_pos = jnp.sum(msk)
    # Unguarded divide matches the PyTorch reference (inf/NaN if there are no positives).
    loss_ref[...] = jnp.reshape(loss_sum / num_pos, (1, 1))


def focal_loss(out, target, ind, mask, *, num_classes, gamma=2.0, alpha=0.25):
    """JAX/Pallas equivalent of FocalLoss(num_classes, gamma, alpha).forward(...)."""
    # alpha weighting is commented out in the PyTorch reference forward; kept for parity.
    del alpha
    B, C, H, W = out.shape
    assert C == num_classes, "out channels must equal num_classes"
    M = target.shape[1]

    # Gather only the B*M needed pixels directly from the NCHW map (no full-map
    # transpose, no full-map VMEM copy): (B, C, HW) -> take over HW -> (B, C, M).
    flat = out.reshape(B, C, H * W)
    gathered = jnp.take_along_axis(flat, ind.astype(jnp.int32)[:, None, :], axis=2)

    # Free reshapes only; no pads, no transposes (full-array blocks are exempt from
    # the (8,128) divisibility rule).
    tgt = target.astype(jnp.int32).reshape(B, 1, M)
    msk = mask.astype(jnp.float32).reshape(B, 1, M)

    # Single-step kernel: the gathered slab is KiB-scale for CenterNet inputs.
    slab_bytes = gathered.size * 4 + 2 * B * M * 4
    assert slab_bytes < 8 * 1024 * 1024, "gathered slab unexpectedly large for one VMEM block"
    # TODO(synk): add a lane-tiled accumulator path if B*M ever grows to VMEM scale.

    kernel = functools.partial(_focal_loss_kernel, gamma=gamma)
    loss = pl.pallas_call(
        kernel,
        out_shape=jax.ShapeDtypeStruct((1, 1), jnp.float32),
        in_specs=[
            pl.BlockSpec(memory_space=pltpu.MemorySpace.VMEM),   # gathered logits
            pl.BlockSpec(memory_space=pltpu.MemorySpace.VMEM),   # target ids
            pl.BlockSpec(memory_space=pltpu.MemorySpace.VMEM),   # mask
        ],
        out_specs=pl.BlockSpec(memory_space=pltpu.MemorySpace.VMEM),
    )(gathered, tgt, msk)
    return loss[0, 0]


def _focal_loss_ref(out, target, ind, mask, *, num_classes, gamma=2.0):
    """Pure-JAX reference mirroring the PyTorch forward, for correctness check."""
    B, C, H, W = out.shape
    one_hot = jax.nn.one_hot(target, num_classes + 1)[..., 1:].astype(jnp.float32)
    flat = jnp.transpose(out, (0, 2, 3, 1)).reshape(B, H * W, C)
    pred = jnp.take_along_axis(flat, ind[..., None], axis=1).astype(jnp.float32)
    sig = jax.nn.sigmoid(pred)
    pt = jnp.abs(one_hot - sig)
    bce = jnp.maximum(pred, 0.0) - pred * one_hot + jnp.log1p(jnp.exp(-jnp.abs(pred)))
    loss = bce * (pt ** gamma) * mask.astype(jnp.float32)[..., None]
    return loss.sum() / mask.astype(jnp.float32).sum()


if __name__ == "__main__":
    # Module config (deterministic, no checkpoint): num_classes=4, gamma=2.0, alpha=0.25
    num_classes, gamma, alpha = 4, 2.0, 0.25
    B, C, H, W, M = 2, num_classes, 16, 16, 8

    key = jax.random.PRNGKey(0)
    k_out, k_tgt, k_ind = jax.random.split(key, 3)

    out = jax.random.normal(k_out, (B, C, H, W), dtype=jnp.float32)
    target = jax.random.randint(k_tgt, (B, M), 0, num_classes + 1, dtype=jnp.int32)
    target = target.at[:, 0].set(1)          # guarantee at least one positive sample
    ind = jax.random.randint(k_ind, (B, M), 0, H * W, dtype=jnp.int32)
    mask = (target > 0).astype(jnp.int32)    # positives, as in CenterNet targets

    loss = focal_loss(out, target, ind, mask,
                      num_classes=num_classes, gamma=gamma, alpha=alpha)
    loss = jax.block_until_ready(loss)

    ref = _focal_loss_ref(out, target, ind, mask, num_classes=num_classes, gamma=gamma)
    # Exact in-kernel sigmoid -> tight tolerance.
    assert jnp.allclose(loss, ref, rtol=1e-5, atol=1e-6), (loss, ref)

    print("KERNEL_OK")
</pallas_src>

<mosaic_0001>
module attributes {stable_mosaic.version = 11 : i64} {
  func.func @_focal_loss_kernel(%arg0: memref<2x4x8xf32, #tpu.memory_space<vmem>>, %arg1: memref<2x1x8xi32, #tpu.memory_space<vmem>>, %arg2: memref<2x1x8xf32, #tpu.memory_space<vmem>>, %arg3: memref<1x1xf32, #tpu.memory_space<vmem>>) attributes {dimension_semantics = [], scalar_prefetch = 0 : i64, scratch_operands = 0 : i64, tpu.core_type = #tpu.core_type<tc>} {
    %c0 = arith.constant 0 : index
    %c0_0 = arith.constant 0 : index
    %c0_1 = arith.constant 0 : index
    %0 = vector.load %arg0[%c0, %c0_0, %c0_1] : memref<2x4x8xf32, #tpu.memory_space<vmem>>, vector<2x4x8xf32>
    %c0_2 = arith.constant 0 : index
    %c0_3 = arith.constant 0 : index
    %c0_4 = arith.constant 0 : index
    %1 = vector.load %arg1[%c0_2, %c0_3, %c0_4] : memref<2x1x8xi32, #tpu.memory_space<vmem>>, vector<2x1x8xi32>
    %c0_5 = arith.constant 0 : index
    %c0_6 = arith.constant 0 : index
    %c0_7 = arith.constant 0 : index
    %2 = vector.load %arg2[%c0_5, %c0_6, %c0_7] : memref<2x1x8xf32, #tpu.memory_space<vmem>>, vector<2x1x8xf32>
    %3 = tpu.iota {dimensions = array<i32: 1>} : vector<2x4x8xi32>
    %c1_i32 = arith.constant 1 : i32
    %4 = vector.broadcast %c1_i32 : i32 to vector<2x4x8xi32>
    %5 = arith.addi %3, %4 : vector<2x4x8xi32>
    %6 = vector.broadcast %1 : vector<2x1x8xi32> to vector<2x4x8xi32>
    %7 = arith.cmpi eq, %5, %6 : vector<2x4x8xi32>
    %8 = arith.extui %7 : vector<2x4x8xi1> to vector<2x4x8xi32>
    %9 = arith.sitofp %8 : vector<2x4x8xi32> to vector<2x4x8xf32>
    %10 = math.absf %0 : vector<2x4x8xf32>
    %cst = arith.constant 0.000000e+00 : f32
    %11 = vector.broadcast %cst : f32 to vector<2x4x8xf32>
    %12 = arith.subf %11, %10 : vector<2x4x8xf32>
    %13 = math.exp %12 : vector<2x4x8xf32>
    %cst_8 = arith.constant 1.000000e+00 : f32
    %14 = vector.broadcast %cst_8 : f32 to vector<2x4x8xf32>
    %15 = arith.addf %14, %13 : vector<2x4x8xf32>
    %cst_9 = arith.constant 1.000000e+00 : f32
    %16 = vector.broadcast %cst_9 : f32 to vector<2x4x8xf32>
    %17 = arith.divf %16, %15 : vector<2x4x8xf32>
    %cst_10 = arith.constant 0.000000e+00 : f32
    %18 = vector.broadcast %cst_10 : f32 to vector<2x4x8xf32>
    %19 = arith.cmpf oge, %0, %18 : vector<2x4x8xf32>
    %20 = arith.mulf %13, %17 : vector<2x4x8xf32>
    %21 = arith.select %19, %17, %20 : vector<2x4x8xi1>, vector<2x4x8xf32>
    %22 = arith.subf %9, %21 : vector<2x4x8xf32>
    %23 = math.absf %22 : vector<2x4x8xf32>
    %cst_11 = arith.constant 0.000000e+00 : f32
    %24 = vector.broadcast %cst_11 : f32 to vector<2x4x8xf32>
    %25 = arith.maximumf %0, %24 : vector<2x4x8xf32>
    %26 = arith.mulf %0, %9 : vector<2x4x8xf32>
    %27 = arith.subf %25, %26 : vector<2x4x8xf32>
    %28 = math.log1p %13 : vector<2x4x8xf32>
    %29 = arith.addf %27, %28 : vector<2x4x8xf32>
    %30 = arith.mulf %23, %23 : vector<2x4x8xf32>
    %31 = arith.mulf %29, %30 : vector<2x4x8xf32>
    %cst_12 = arith.constant dense<0.000000e+00> : vector<2x8xf32>
    %32 = vector.multi_reduction <add>, %31, %cst_12 [1] : vector<2x4x8xf32> to vector<2x8xf32>
    %33 = vector.shape_cast %32 : vector<2x8xf32> to vector<2x1x8xf32>
    %34 = arith.mulf %33, %2 : vector<2x1x8xf32>
    %35 = vector.shape_cast %34 : vector<2x1x8xf32> to vector<1x2x1x8xf32>
    %cst_13 = arith.constant dense<0.000000e+00> : vector<1xf32>
    %36 = vector.multi_reduction <add>, %35, %cst_13 [1, 2, 3] : vector<1x2x1x8xf32> to vector<1xf32>
    %37 = vector.shape_cast %36 : vector<1xf32> to vector<1x1x1x1xf32>
    %38 = vector.extract %37[0, 0, 0, 0] : f32 from vector<1x1x1x1xf32>
    %39 = vector.shape_cast %2 : vector<2x1x8xf32> to vector<1x2x1x8xf32>
    %cst_14 = arith.constant dense<0.000000e+00> : vector<1xf32>
    %40 = vector.multi_reduction <add>, %39, %cst_14 [1, 2, 3] : vector<1x2x1x8xf32> to vector<1xf32>
    %41 = vector.shape_cast %40 : vector<1xf32> to vector<1x1x1x1xf32>
    %42 = vector.extract %41[0, 0, 0, 0] : f32 from vector<1x1x1x1xf32>
    %43 = arith.divf %38, %42 : f32
    %44 = vector.broadcast %43 : f32 to vector<1x1xf32>
    %c0_15 = arith.constant 0 : index
    %c0_16 = arith.constant 0 : index
    %45 = vector.load %arg3[%c0_15, %c0_16] : memref<1x1xf32, #tpu.memory_space<vmem>>, vector<1x1xf32>
    tpu.vector_store %arg3[%c0_15, %c0_16], %44 {strides = array<i32>} : memref<1x1xf32, #tpu.memory_space<vmem>>, vector<1x1xf32>,
    return
  }
}

</mosaic_0001>

<bundles_post_ra>
// kernel: tpu_custom_call.1
= control target key start
LH: loop header
LB: loop body
LE: loop exit
PB: predicated region body
PF: predicated region fallthrough
CT: control target
= control target key end

     0   :  { %8 = vsyncpa [#allocation3], 0  ;;  %s326_s0 = inlined_call_operand.hbm [shape: f32[2,4,8], index: 0, kind: input, shape index: {}]   ;;  %s327_s1 = inlined_call_operand.hbm [shape: s32[2,1,8], index: 1, kind: input, shape index: {}]   ;;  %s328_s2 = inlined_call_operand.vmem [shape: f32[2,1,8], index: 2, kind: input, shape index: {}]   ;;  %s329_s3 = inlined_call_operand.hbm [shape: f32[1,1], index: 3, kind: output, shape index: {}]  }
   0x1   :  { %9 = vsyncpa [#allocation6], 0 }
   0x2   :  { %10 = vsyncpa [#allocation4], 0  ;;  %s283_s12 = smov [#allocation2]  }
   0x3   :  { %s16_s13 = sshll.u32 %s283_s12, 4  ;;  %s17_s13 = int_to_ptr.vmem [resolvable:$true] %s16_s13 }
   0x4   :  { %s225_s14 = scalar_lea.vmem %s17_s13, 128  ;;  %p230_p1 = scmp.lt.s32.totalorder %s17_s13, %s17_s13 }
   0x5   :  { %p226_p0 = scmp.ne.s32.totalorder %s17_s13, %s225_s14  ;;  %p231_p2 = scmp.lt.s32.totalorder %s225_s14, %s225_s14 }
   0x7   :  { %p232_p3 = por %p231_p2, %p230_p1 }
   0x9   :  { %p233_p4 = pnand %p232_p3, %p226_p0 }
   0xb   :  { %236 = shalt.err (!%p233_p4)
}
   0xc   :  { %s284_s15 = smov 64   ;;  %s285_s16 = smov 4  }
   0xd   :  { %22 = dma.hbm_to_vmem [thread:$0]  %s326_s0, 128, %s17_s13, [#allocation3], %s284_s15, %s284_s15, %s285_s16  }
   0xe   :  { %s286_s19 = smov [#allocation5]  }
   0xf   :  { %s28_s20 = sshll.u32 %s286_s19, 4  ;;  %s29_s20 = int_to_ptr.vmem [resolvable:$true] %s28_s20 }
  0x10   :  { %s245_s21 = scalar_lea.vmem %s29_s20, 32  ;;  %p250_p6 = scmp.lt.s32.totalorder %s29_s20, %s29_s20 }
  0x11   :  { %p246_p5 = scmp.ne.s32.totalorder %s29_s20, %s245_s21  ;;  %p251_p7 = scmp.lt.s32.totalorder %s245_s21, %s245_s21 }
  0x13   :  { %p252_p8 = por %p251_p7, %p250_p6 }
  0x15   :  { %p253_p9 = pnand %p252_p8, %p246_p5 }
  0x17   :  { %256 = shalt.err (!%p253_p9)
}
  0x18   :  { %s287_s22 = smov 16   ;;  %s288_s23 = smov 1  }
  0x19   :  { %34 = dma.hbm_to_vmem [thread:$0]  %s327_s1, 32, %s29_s20, [#allocation6], %s287_s22, %s287_s22, %s288_s23  }
  0x1a   :  { %277 = dma.done.wait [#allocation3], 128  }
  0x1b   :  { %278 = vsyncadd [#allocation3], 4294967168 }
  0x1c   :  { %279 = dma.done.wait [#allocation6], 32  }
  0x1d   :  { %280 = vsyncadd [#allocation6], 4294967264  ;;  %v43_v0 = vld [vmem:[#allocation2] sm:$0xf]  ;;  %v44_v1 = vld [vmem:[#allocation2 + $0x4] sm:$0xf]  ;;  %v49_v8 = vlaneseq }
  0x1e   :  { %v66_v2 = vand.u32 2147483647, %v43_v0  ;;  %v67_v3 = vand.u32 2147483647, %v44_v1  ;;  %v185_v15 = vld [vmem:[#allocation5] ss:$0 sm:$0xff] }
  0x1f   :  { %v50_v10 = vshrl.u32 %v49_v8, 7  ;;  %v186_v16 = vld [vmem:[#allocation5 + $0x1] ss:$0 sm:$0xff]  ;;  %v289_v19 = vmov 0.0   ;;  %v90_v23 = vmax.f32 %v43_v0, 0.0  ;;  %v91_v27 = vmax.f32 %v44_v1, 0.0 }
  0x20   :  { %v68_v4 = vsub.f32 0.0, %v66_v2  ;;  %v69_v5 = vsub.f32 0.0, %v67_v3  ;;  %vm80_vm2 = vcmp.ge.f32.partialorder %v43_v0, 0.0  ;;  %vm81_vm3 = vcmp.ge.f32.partialorder %v44_v1, 0.0  ;;  %v47_v3 = vld [vmem:[%s328_s2] sm:$0x1] }
  0x21   :  { %v51_v14 = vadd.s32 1, %v50_v10  ;;  %vm120_vm6 = vcmask 60416   ;;  %vm137_vm7 = vcmask 57344   ;;  %s290_s29 = smov [#allocation7]   ;;  %vm167_vm8 = vcmask 0  }
  0x22   :  { %v70_v6 = vmul.f32 1.442695, %v68_v4  ;;  %v72_v7 = vmul.f32 1.442695, %v69_v5  ;;  %v48_v5 = vld [vmem:[%s328_s2 + $0x1] sm:$0x1] }
  0x23   :  { %vm60_vm0 = vcmp.eq.s32.totalorder %v51_v14, %v185_v15  ;;  %vm61_vm1 = vcmp.eq.s32.totalorder %v51_v14, %v186_v16  ;;  %s175_s30 = sshll.u32 %s290_s29, 4  ;;  %s176_s30 = int_to_ptr.vmem [resolvable:$true] %s175_s30 }
  0x24   :  { %203 = vpow2.f32 %v70_v6  ;;  %v187_v20 = vsel %vm60_vm0, 1.0, %v289_v19  ;;  %v188_v21 = vsel %vm61_vm1, 1.0, %v289_v19  ;;  %s257_s6 = scalar_lea.vmem %s176_s30, 16  ;;  %s261_s7 = scalar_lea.vmem %s176_s30, 32 }
  0x25   :  { %205 = vpow2.f32 %v72_v7  ;;  %v92_v24 = vmul.f32 %v187_v20, %v43_v0  ;;  %v93_v28 = vmul.f32 %v188_v21, %v44_v1  ;;  %p258_p10 = scmp.ne.s32.totalorder %s176_s30, %s257_s6  ;;  %p262_p11 = scmp.lt.s32.totalorder %s176_s30, %s176_s30 }
  0x26   :  { %p263_p12 = scmp.lt.s32.totalorder %s261_s7, %s257_s6 }
  0x27   :  { %v94_v36 = vsub.f32 %v90_v23, %v92_v24  ;;  %v95_v40 = vsub.f32 %v91_v27, %v93_v28 }
  0x28   :  { %p264_p13 = por %p263_p12, %p262_p11 }
  0x2a   :  { %p265_p0 = pnand %p264_p13, %p258_p10 }
  0x31   :  { %v204_v9 = vpop.eup %203 }
  0x32   :  { %v206_v11 = vpop.eup %205  ;;  %v74_v12 = vadd.f32 1.0, %v204_v9  ;;  %v99_v17 = vmul.f32 -0.5, %v204_v9  ;;  %v102_v25 = vand.u32 2147483647, %v204_v9 }
  0x33   :  { %v75_v13 = vadd.f32 1.0, %v206_v11  ;;  %v108_v18 = vmul.f32 -0.5, %v206_v11  ;;  %v111_v29 = vand.u32 2147483647, %v206_v11 }
  0x34   :  { %207 = vrcp.f32 %v74_v12  ;;  %v100_v22 = vadd.f32 1.0, %v99_v17  ;;  %vm103_vm4 = vcmp.lt.f32.partialorder %v102_v25, 0.0004427343 }
  0x35   :  { %209 = vrcp.f32 %v75_v13  ;;  %v109_v26 = vadd.f32 1.0, %v108_v18  ;;  %vm112_vm5 = vcmp.lt.f32.partialorder %v111_v29, 0.0004427343 }
  0x36   :  { %211 = vlog2.f32 %v74_v12  ;;  %v101_v33 = vmul.f32 %v204_v9, %v100_v22  ;;  %v150_v12 = vsel %vm137_vm7, %v47_v3, 0.0 }
  0x37   :  { %213 = vlog2.f32 %v75_v13  ;;  %v110_v37 = vmul.f32 %v206_v11, %v109_v26  ;;  %v151_v13 = vsel %vm137_vm7, %v48_v5, 0.0 }
  0x38   :  { %v152_v15 = vadd.f32 %v151_v13, %v150_v12 }
  0x41   :  { %v208_v30 = vpop.eup %207 }
  0x42   :  { %v210_v31 = vpop.eup %209  ;;  %v82_v32 = vmul.f32 %v208_v30, %v204_v9 }
  0x43   :  { %v212_v34 = vpop.eup %211  ;;  %v83_v35 = vmul.f32 %v210_v31, %v206_v11 }
  0x44   :  { %v214_v38 = vpop.eup %213  ;;  %v84_v39 = vsel %vm80_vm2, %v208_v30, %v82_v32  ;;  %v98_v41 = vmul.f32 0.6931472, %v212_v34 }
  0x45   :  { %v85_v42 = vsel %vm81_vm3, %v210_v31, %v83_v35  ;;  %v86_v43 = vsub.f32 %v187_v20, %v84_v39  ;;  %v107_v44 = vmul.f32 0.6931472, %v214_v38 }
  0x46   :  { %v87_v45 = vsub.f32 %v188_v21, %v85_v42  ;;  %v104_v46 = vsel %vm103_vm4, %v101_v33, %v98_v41 }
  0x47   :  { %v88_v47 = vand.u32 2147483647, %v86_v43  ;;  %v113_v48 = vsel %vm112_vm5, %v110_v37, %v107_v44  ;;  %v114_v49 = vadd.f32 %v104_v46, %v94_v36 }
  0x48   :  { %v89_v50 = vand.u32 2147483647, %v87_v45  ;;  %v115_v51 = vadd.f32 %v113_v48, %v95_v40 }
  0x49   :  { %v116_v52 = vmul.f32 %v88_v47, %v88_v47 }
  0x4a   :  { %v117_v53 = vmul.f32 %v89_v50, %v89_v50 }
  0x4b   :  { %v118_v54 = vmul.f32 %v116_v52, %v114_v49 }
  0x4c   :  { %v119_v55 = vmul.f32 %v117_v53, %v115_v51 }
  0x4d   :  { %v121_v56 = vsel %vm120_vm6, %v118_v54, 0.0 }
  0x4e   :  { %v122_v57 = vrot.slane %v121_v56, 4  ;;  %v128_v58 = vsel %vm120_vm6, %v119_v55, 0.0 }
  0x4f   :  { %v129_v59 = vrot.slane %v128_v58, 4 }
  0x50   :  { %v123_v60 = vadd.f32 %v122_v57, %v121_v56 }
  0x51   :  { %v130_v61 = vadd.f32 %v129_v59, %v128_v58 }
  0x52   :  { %v124_v62 = vrot.slane %v123_v60, 2 }
  0x53   :  { %v131_v63 = vrot.slane %v130_v61, 2 }
  0x54   :  { %v125_v0 = vadd.f32 %v124_v62, %v123_v60 }
  0x55   :  { %v132_v1 = vadd.f32 %v131_v63, %v130_v61 }
  0x56   :  { %v126_v2 = vrot.slane %v125_v0, 1 }
  0x57   :  { %v133_v4 = vrot.slane %v132_v1, 1 }
  0x58   :  { %v127_v6 = vadd.f32 %v126_v2, %v125_v0 }
  0x59   :  { %v134_v7 = vadd.f32 %v133_v4, %v132_v1 }
  0x5a   :  { %v135_v8 = vmul.f32 %v127_v6, %v47_v3 }
  0x5b   :  { %v136_v9 = vmul.f32 %v134_v7, %v48_v5 }
  0x5c   :  { %v138_v10 = vsel %vm137_vm7, %v135_v8, 0.0 }
  0x5d   :  { %v139_v11 = vsel %vm137_vm7, %v136_v9, 0.0 }
  0x5e   :  { %v140_v14 = vadd.f32 %v139_v11, %v138_v10 }
  0x60   :  { %141 = vadd.xlane.f32.xlu0 %v140_v14 }
  0x64   :  { %153 = vadd.xlane.f32.xlu0 %v152_v15 }
  0xe9   :  { %v142_v16 = vpop.xlane.xlu0 %141 }
  0xea   :  { %v143_v17 = vrot.slane %v142_v16, 4 }
  0xec   :  { %v144_v18 = vadd.f32 %v143_v17, %v142_v16 }
  0xed   :  { %v154_v19 = vpop.xlane.xlu0 %153 }
  0xee   :  { %v145_v20 = vrot.slane %v144_v18, 2  ;;  %v155_v21 = vrot.slane %v154_v19, 4 }
  0xf0   :  { %v156_v22 = vadd.f32 %v155_v21, %v154_v19  ;;  %v146_v23 = vadd.f32 %v145_v20, %v144_v18 }
  0xf2   :  { %v157_v24 = vrot.slane %v156_v22, 2  ;;  %v147_v25 = vrot.slane %v146_v23, 1 }
  0xf4   :  { %v158_v26 = vadd.f32 %v157_v24, %v156_v22  ;;  %v148_v27 = vadd.f32 %v147_v25, %v146_v23 }
  0xf6   :  { %189 = vpush %v148_v27  ;;  %v159_v28 = vrot.slane %v158_v26, 1 }
  0xf8   :  { %v160_v29 = vadd.f32 %v159_v28, %v158_v26 }
  0xfa   :  { %191 = vpush %v160_v29 }
 0x127   :  { %s190_s2 = spop %189 }
 0x12b   :  { %s192_s28 = spop %191 }
 0x12c   :  { %v162_v30 = vstv %s192_s28 }
 0x12d   :  { %215 = vrcp.f32 %v162_v30 }
 0x13a   :  { %v216_v31 = vpop.eup %215 }
 0x13b   :  { %193 = vpush %v216_v31 }
 0x16c   :  { %s194_s4 = spop %193 }
 0x16d   :  { %s165_s5 = smul.f32 %s194_s4, %s190_s2 }
 0x16f   :  { %v166_v32 = vstv %s165_s5 }
 0x170   :  { %168 = vst.msk [vmem:[#allocation7] sm:$0x1] %vm167_vm8, %v166_v32 }
 0x171   :  { %268 = shalt.err (!%p265_p0)
}
 0x172   :  { %178 = dma.vmem_to_hbm [thread:$0]  %s176_s30, 16, %s329_s3, [#allocation4]  }
 0x173   :  { %281 = dma.done.wait [#allocation4], 16  }
 0x174   :  { %282 = vsyncadd [#allocation4], 4294967280 }
 0x175   :  { %182 = vsyncpa [#allocation3], 1 }
 0x176   :  { %183 = vsyncpa [#allocation6], 1 }
 0x177   :  { %184 = vsyncpa [#allocation4], 1 }

</bundles_post_ra>
